<compile_context>
chip_gen: v7x
topology: tpu7x:2x2x1
jax: 0.10.0
libtpu: 0.0.40
codegen_flags: <defaults>
</compile_context>

<pallas_src>
import functools

import jax
import jax.numpy as jnp
from jax import lax
from jax.experimental import pallas as pl
from jax.experimental.pallas import tpu as pltpu


def _vmem_limit_bytes():
    # ~48 MiB on v7x (64 MiB physical), ~96 MiB on v5e/v6e (128 MiB physical).
    try:
        cap = int(pltpu.get_tpu_info().vmem_capacity_bytes)
    except Exception:
        cap = 64 * 1024 * 1024
    return int(min(cap * 3 // 4, 100 * 1024 * 1024))


_VMEM_LIMIT = _vmem_limit_bytes()


# --------------------------------------------------------------------------
# helpers
# --------------------------------------------------------------------------
def _pick_tile(dim, candidates):
    """Largest candidate tile that evenly divides `dim`, else the full dim."""
    # TODO(synk): for huge non-divisible dims, pad + mask instead of full-dim fallback.
    for c in candidates:
        if dim % c == 0:
            return c
    return dim


def _pick_group(heads_n, hsz, cap=512):
    """Heads packed per grid step; G*hsz must be 128-aligned or the full tsz."""
    limit = min(heads_n, max(1, cap // hsz))
    for g in range(limit, 0, -1):
        if heads_n % g == 0 and (g * hsz) % 128 == 0:
            return g
    return heads_n  # G*hsz == tsz == full last dim -> always a legal block


def _mask_to_bias(mask):
    """bool mask (True = masked) -> additive -inf bias; float mask -> additive."""
    if mask.dtype == jnp.bool_:
        return jnp.where(mask, -jnp.inf, 0.0).astype(jnp.float32)
    return mask.astype(jnp.float32)


def _build_bias(kp_ref, am_ref, is_causal, rows, cols, row_off, col_off):
    """Additive bias for one (rows, cols) score tile; may return None."""
    bias = None
    if kp_ref is not None:
        bias = kp_ref[0]                                     # (1, cols)
    if am_ref is not None:
        am = am_ref[...]                                     # (rows, cols)
        bias = am if bias is None else bias + am
    if is_causal:
        row = row_off + lax.broadcasted_iota(jnp.int32, (rows, cols), 0)
        col = col_off + lax.broadcasted_iota(jnp.int32, (rows, cols), 1)
        cm = jnp.where(col > row, -jnp.inf, 0.0)
        bias = cm if bias is None else bias + cm
    return bias


# --------------------------------------------------------------------------
# tiled linear:  y = x @ w_t + b    (w_t is the pre-transposed (K, N) weight)
# --------------------------------------------------------------------------
def _linear_kernel(x_ref, w_ref, b_ref, o_ref, acc_ref, *, compute_dtype):
    kk = pl.program_id(2)

    @pl.when(kk == 0)
    def _():
        acc_ref[...] = jnp.zeros(acc_ref.shape, acc_ref.dtype)

    acc_ref[...] += jnp.dot(x_ref[...].astype(compute_dtype),      # (tm, tk)
                            w_ref[...].astype(compute_dtype),      # (tk, tn)
                            preferred_element_type=jnp.float32)

    @pl.when(kk == pl.num_programs(2) - 1)
    def _():
        o_ref[...] = (acc_ref[...] + b_ref[...]).astype(o_ref.dtype)


def pallas_linear(x, w_t, b, compute_dtype=None):
    """nn.Linear semantics: y = x @ w_t + b.  x: (M, K), w_t: (K, N), b: (N,)."""
    M, K = x.shape
    N = w_t.shape[1]
    if compute_dtype is None:
        compute_dtype = x.dtype
    tm = _pick_tile(M, (256, 128))
    tn = _pick_tile(N, (256, 128))
    tk = _pick_tile(K, (512, 256, 128))
    kernel = functools.partial(_linear_kernel, compute_dtype=compute_dtype)
    return pl.pallas_call(
        kernel,
        grid=(M // tm, N // tn, K // tk),
        out_shape=jax.ShapeDtypeStruct((M, N), x.dtype),
        in_specs=[pl.BlockSpec((tm, tk), lambda i, j, kk: (i, kk)),
                  pl.BlockSpec((tk, tn), lambda i, j, kk: (kk, j)),
                  pl.BlockSpec((1, tn), lambda i, j, kk: (0, j))],
        out_specs=pl.BlockSpec((tm, tn), lambda i, j, kk: (i, j)),
        scratch_shapes=[pltpu.VMEM((tm, tn), jnp.float32)],
        compiler_params=pltpu.CompilerParams(
            dimension_semantics=("parallel", "parallel", "arbitrary"),
            vmem_limit_bytes=_VMEM_LIMIT),
    )(x, w_t, b.reshape(1, N))


# --------------------------------------------------------------------------
# attention kernel A: full-score path (also returns attention weights)
# --------------------------------------------------------------------------
def _attn_weights_kernel(q_ref, k_ref, v_ref, *rest,
                         G, hsz, tq, is_causal, has_kp, has_am, compute_dtype):
    refs = list(rest)
    kp_ref = refs.pop(0) if has_kp else None
    am_ref = refs.pop(0) if has_am else None
    o_ref, w_ref = refs

    Sk = k_ref.shape[1]
    qi = pl.program_id(2)
    bias = _build_bias(kp_ref, am_ref, is_causal, tq, Sk, qi * tq, 0)

    o_parts = []
    for g in range(G):                                      # static, unrolled
        lo, hi = g * hsz, (g + 1) * hsz
        qg = q_ref[0, :, lo:hi].astype(compute_dtype)       # (tq, hsz)
        kg = k_ref[0, :, lo:hi].astype(compute_dtype)       # (Sk, hsz)
        vg = v_ref[0, :, lo:hi].astype(compute_dtype)       # (Sk, hsz)

        s = lax.dot_general(qg, kg, (((1,), (1,)), ((), ())),
                            preferred_element_type=jnp.float32)        # (tq, Sk)
        if bias is not None:
            s = s + bias
        m = jnp.max(s, axis=-1, keepdims=True)
        m = jnp.where(m == -jnp.inf, 0.0, m)                # keep masked rows finite
        e = jnp.exp(s - m)
        denom = jnp.sum(e, axis=-1, keepdims=True)
        inv = jnp.where(denom > 0.0, 1.0 / denom, 0.0)
        attn_w = e * inv
        # TODO(synk): fully-masked rows yield 0-weights here (torch softmax gives NaN);
        #             the attention *output* matches torch's nan_to_num(0) either way.
        w_ref[0, g] = attn_w.astype(w_ref.dtype)            # (tq, Sk) lane-dense
        o_parts.append(jnp.dot(attn_w.astype(compute_dtype), vg,
                               preferred_element_type=jnp.float32))

    o_blk = o_parts[0] if G == 1 else jnp.concatenate(o_parts, axis=-1)
    o_ref[0] = o_blk.astype(o_ref.dtype)                    # one (tq, GH) store


def pallas_attention_weights(q, k, v, kp_bias, am_bias, is_causal, G, hsz,
                             compute_dtype):
    """q/k/v: (B, S, tsz).  Returns (attn_val (B,Sq,tsz), attn_ws (B,H,Sq,Sk))."""
    B, Sq, tsz = q.shape
    Sk = k.shape[1]
    H = tsz // hsz
    GH = G * hsz
    n_groups = H // G
    tq = _pick_tile(Sq, (256, 128))
    has_kp = kp_bias is not None
    has_am = am_bias is not None

    kernel = functools.partial(_attn_weights_kernel, G=G, hsz=hsz, tq=tq,
                               is_causal=is_causal, has_kp=has_kp,
                               has_am=has_am, compute_dtype=compute_dtype)
    in_specs = [pl.BlockSpec((1, tq, GH), lambda b, g, qi: (b, qi, g)),
                pl.BlockSpec((1, Sk, GH), lambda b, g, qi: (b, 0, g)),
                pl.BlockSpec((1, Sk, GH), lambda b, g, qi: (b, 0, g))]
    args = [q, k, v]
    if has_kp:
        in_specs.append(pl.BlockSpec((1, 1, Sk), lambda b, g, qi: (b, 0, 0)))
        args.append(kp_bias)
    if has_am:
        in_specs.append(pl.BlockSpec((tq, Sk), lambda b, g, qi: (qi, 0)))
        args.append(am_bias)

    return pl.pallas_call(
        kernel,
        grid=(B, n_groups, Sq // tq),
        out_shape=(jax.ShapeDtypeStruct((B, Sq, tsz), q.dtype),
                   jax.ShapeDtypeStruct((B, H, Sq, Sk), q.dtype)),
        in_specs=in_specs,
        out_specs=(pl.BlockSpec((1, tq, GH), lambda b, g, qi: (b, qi, g)),
                   pl.BlockSpec((1, G, tq, Sk), lambda b, g, qi: (b, g, qi, 0))),
        compiler_params=pltpu.CompilerParams(
            dimension_semantics=("parallel", "parallel", "parallel"),
            vmem_limit_bytes=_VMEM_LIMIT),
    )(*args)


# --------------------------------------------------------------------------
# attention kernel B: flash path (no attention-weight writeback)
# --------------------------------------------------------------------------
def _flash_attn_kernel(q_ref, k_ref, v_ref, *rest,
                       G, hsz, tq, tk, is_causal, has_kp, has_am, compute_dtype):
    refs = list(rest)
    kp_ref = refs.pop(0) if has_kp else None
    am_ref = refs.pop(0) if has_am else None
    o_ref, m_sc, l_sc, acc_sc = refs          # m/l: (G, tq, 128); acc: (tq, GH)

    qi = pl.program_id(2)
    ki = pl.program_id(3)

    @pl.when(ki == 0)
    def _():
        m_sc[...] = jnp.full(m_sc.shape, -jnp.inf, m_sc.dtype)
        l_sc[...] = jnp.zeros(l_sc.shape, l_sc.dtype)
        acc_sc[...] = jnp.zeros(acc_sc.shape, acc_sc.dtype)

    def compute_tile():
        bias = _build_bias(kp_ref, am_ref, is_causal, tq, tk, qi * tq, ki * tk)
        alphas, pvs = [], []
        for g in range(G):                                  # static, unrolled
            lo, hi = g * hsz, (g + 1) * hsz
            qg = q_ref[0, :, lo:hi].astype(compute_dtype)   # (tq, hsz)
            kg = k_ref[0, :, lo:hi].astype(compute_dtype)   # (tk, hsz)
            vg = v_ref[0, :, lo:hi].astype(compute_dtype)   # (tk, hsz)

            s = lax.dot_general(qg, kg, (((1,), (1,)), ((), ())),
                                preferred_element_type=jnp.float32)    # (tq, tk)
            if bias is not None:
                s = s + bias

            m_prev = m_sc[g]                                # (tq, 128) lane-dense
            s_max = jnp.max(s, axis=-1, keepdims=True)      # (tq, 1)
            m_next = jnp.maximum(m_prev, s_max)             # (tq, 128) row-bcast
            m_safe = jnp.where(m_next == -jnp.inf, 0.0, m_next)
            alpha = jnp.exp(m_prev - m_safe)                # (tq, 128)
            p = jnp.exp(s - m_safe[:, :1])                  # (tq, tk)

            l_sc[g] = alpha * l_sc[g] + jnp.sum(p, axis=-1, keepdims=True)
            m_sc[g] = m_next

            if hsz <= 128:
                a_head = alpha[:, :hsz]                     # columns identical
            else:
                a_head = jnp.broadcast_to(alpha[:, :1], (tq, hsz))
            alphas.append(a_head)
            pvs.append(jnp.dot(p.astype(compute_dtype), vg,
                               preferred_element_type=jnp.float32))

        alpha_full = alphas[0] if G == 1 else jnp.concatenate(alphas, axis=-1)
        pv_full = pvs[0] if G == 1 else jnp.concatenate(pvs, axis=-1)
        acc_sc[...] = alpha_full * acc_sc[...] + pv_full    # one (tq, GH) update

    if is_causal:
        # Skip KV tiles strictly above the diagonal: no MXU / exp work for them
        # (their DMA is index-map driven and still happens, which is fine).
        @pl.when(ki * tk <= qi * tq + (tq - 1))
        def _():
            compute_tile()
    else:
        compute_tile()

    @pl.when(ki == pl.num_programs(3) - 1)
    def _():
        parts = []
        for g in range(G):
            lo, hi = g * hsz, (g + 1) * hsz
            lg = l_sc[g, :, :hsz] if hsz <= 128 else l_sc[g, :, :1]
            inv = jnp.where(lg > 0.0, 1.0 / lg, 0.0)        # exact; epilogue only
            parts.append(acc_sc[:, lo:hi] * inv)
        o_blk = parts[0] if G == 1 else jnp.concatenate(parts, axis=-1)
        o_ref[0] = o_blk.astype(o_ref.dtype)                # one lane-dense store


def pallas_attention_flash(q, k, v, kp_bias, am_bias, is_causal, G, hsz,
                           compute_dtype):
    """q/k/v: (B, S, tsz).  Returns attn_val (B, Sq, tsz) only."""
    B, Sq, tsz = q.shape
    Sk = k.shape[1]
    GH = G * hsz
    n_groups = tsz // GH
    tq = _pick_tile(Sq, (512, 256, 128))
    tk = _pick_tile(Sk, (512, 256, 128))
    has_kp = kp_bias is not None
    has_am = am_bias is not None

    kernel = functools.partial(_flash_attn_kernel, G=G, hsz=hsz, tq=tq, tk=tk,
                               is_causal=is_causal, has_kp=has_kp, has_am=has_am,
                               compute_dtype=compute_dtype)
    in_specs = [pl.BlockSpec((1, tq, GH), lambda b, g, qi, ki: (b, qi, g)),
                pl.BlockSpec((1, tk, GH), lambda b, g, qi, ki: (b, ki, g)),
                pl.BlockSpec((1, tk, GH), lambda b, g, qi, ki: (b, ki, g))]
    args = [q, k, v]
    if has_kp:
        in_specs.append(pl.BlockSpec((1, 1, tk), lambda b, g, qi, ki: (b, 0, ki)))
        args.append(kp_bias)
    if has_am:
        in_specs.append(pl.BlockSpec((tq, tk), lambda b, g, qi, ki: (qi, ki)))
        args.append(am_bias)

    return pl.pallas_call(
        kernel,
        grid=(B, n_groups, Sq // tq, Sk // tk),
        out_shape=jax.ShapeDtypeStruct((B, Sq, tsz), q.dtype),
        in_specs=in_specs,
        out_specs=pl.BlockSpec((1, tq, GH), lambda b, g, qi, ki: (b, qi, g)),
        scratch_shapes=[pltpu.VMEM((G, tq, 128), jnp.float32),   # m (lane-dense)
                        pltpu.VMEM((G, tq, 128), jnp.float32),   # l (lane-dense)
                        pltpu.VMEM((tq, GH), jnp.float32)],      # acc
        compiler_params=pltpu.CompilerParams(
            dimension_semantics=("parallel", "parallel", "parallel", "arbitrary"),
            vmem_limit_bytes=_VMEM_LIMIT),
    )(*args)


# --------------------------------------------------------------------------
# MultiheadAttention forward (Pallas-backed)
# --------------------------------------------------------------------------
def mha_forward(params, heads_n, query, key, value,
                key_padding_mask=None, attn_mask=None, is_causal=False,
                need_weights=True, compute_dtype=None):
    # TODO(synk): dropout_p > 0 (training-mode dropout) and NestedTensor inputs
    #             are not implemented.
    w_in, b_in = params["in_proj_w"], params["in_proj_b"]      # (3*tsz, qsz), (3*tsz,)
    w_out, b_out = params["out_proj_w"], params["out_proj_b"]  # (qsz, tsz), (qsz,)

    B, Sq, qsz = query.shape
    Sk = key.shape[1]
    tsz = w_in.shape[0] // 3
    hsz = tsz // heads_n
    if compute_dtype is None:
        # TODO(synk): default to bf16 on v6e/v7x for full MXU rate (callers can opt in).
        compute_dtype = query.dtype
    scale = float(hsz) ** -0.5

    if (query is key) and (key is value):
        # packed in_proj + chunk (self-attention fast path); fold 1/sqrt(hsz)
        # into the q slice and pre-transpose the weight to (K, N).
        row_scale = jnp.concatenate([jnp.full((tsz,), scale, w_in.dtype),
                                     jnp.ones((2 * tsz,), w_in.dtype)])
        w_packed_t = (w_in * row_scale[:, None]).T             # (qsz, 3*tsz)
        qkv = pallas_linear(query.reshape(B * Sq, qsz), w_packed_t,
                            b_in * row_scale, compute_dtype)
        q, k, v = jnp.split(qkv, 3, axis=-1)
        q = q.reshape(B, Sq, tsz)
        k = k.reshape(B, Sq, tsz)
        v = v.reshape(B, Sq, tsz)
    else:
        qw, kw, vw = jnp.split(w_in, 3, axis=0)
        qb, kb, vb = jnp.split(b_in, 3, axis=0)
        q = pallas_linear(query.reshape(B * Sq, -1), (qw * scale).T, qb * scale,
                          compute_dtype).reshape(B, Sq, tsz)
        k = pallas_linear(key.reshape(B * Sk, -1), kw.T, kb,
                          compute_dtype).reshape(B, Sk, tsz)
        v = pallas_linear(value.reshape(B * Sk, -1), vw.T, vb,
                          compute_dtype).reshape(B, Sk, tsz)

    # small mask biases only (no (B, Sq, Sk) materialization; causal is in-kernel)
    kp_bias = (_mask_to_bias(key_padding_mask).reshape(B, 1, Sk)
               if key_padding_mask is not None else None)
    am_bias = _mask_to_bias(attn_mask) if attn_mask is not None else None

    G = _pick_group(heads_n, hsz)          # heads packed per grid step

    if need_weights:
        attn_val, attn_ws = pallas_attention_weights(
            q, k, v, kp_bias, am_bias, is_causal, G, hsz, compute_dtype)
    else:
        attn_val = pallas_attention_flash(
            q, k, v, kp_bias, am_bias, is_causal, G, hsz, compute_dtype)
        attn_ws = None

    out = pallas_linear(attn_val.reshape(B * Sq, tsz), w_out.T, b_out,
                        compute_dtype).reshape(B, Sq, qsz)
    return out, attn_ws


# --------------------------------------------------------------------------
# Pure-JAX reference (same math, no Pallas) for validation
# --------------------------------------------------------------------------
def _build_bias_ref(B, Sq, Sk, key_padding_mask, attn_mask, is_causal):
    bias = jnp.zeros((B, Sq, Sk), jnp.float32)
    if is_causal:
        not_tril = ~jnp.tril(jnp.ones((Sq, Sk), jnp.bool_))
        bias = jnp.where(not_tril[None], -jnp.inf, bias)
    if attn_mask is not None:
        if attn_mask.dtype == jnp.bool_:
            bias = jnp.where(attn_mask[None], -jnp.inf, bias)
        else:
            bias = bias + attn_mask[None].astype(jnp.float32)
    if key_padding_mask is not None:
        if key_padding_mask.dtype == jnp.bool_:
            bias = jnp.where(key_padding_mask[:, None, :], -jnp.inf, bias)
        else:
            bias = bias + key_padding_mask[:, None, :].astype(jnp.float32)
    return bias


def mha_reference(params, heads_n, query, key, value,
                  key_padding_mask=None, attn_mask=None, is_causal=False):
    w_in, b_in = params["in_proj_w"], params["in_proj_b"]
    w_out, b_out = params["out_proj_w"], params["out_proj_b"]
    B, Sq, qsz = query.shape
    Sk = key.shape[1]
    tsz = w_in.shape[0] // 3
    hsz = tsz // heads_n

    qkv = query @ w_in.T + b_in
    q, k, v = jnp.split(qkv, 3, axis=-1)
    q = q.reshape(B, Sq, heads_n, hsz).transpose(0, 2, 1, 3)
    k = k.reshape(B, Sk, heads_n, hsz).transpose(0, 2, 1, 3)
    v = v.reshape(B, Sk, heads_n, hsz).transpose(0, 2, 1, 3)

    bias = _build_bias_ref(B, Sq, Sk, key_padding_mask, attn_mask, is_causal)[:, None]
    scores = (q / jnp.sqrt(jnp.float32(hsz))) @ jnp.swapaxes(k, -1, -2) + bias
    w = jax.nn.softmax(scores, axis=-1)
    out = jnp.nan_to_num(w @ v, nan=0.0)
    out = out.transpose(0, 2, 1, 3).reshape(B, Sq, tsz)
    return out @ w_out.T + b_out, w


# --------------------------------------------------------------------------
if __name__ == "__main__":
    B, S, qsz, heads_n = 2, 8, 32, 4
    tsz = qsz

    root = jax.random.PRNGKey(0)
    k1, k2, k3, k4, k5 = jax.random.split(root, 5)
    params = {
        "in_proj_w": 0.1 * jax.random.normal(k1, (3 * tsz, qsz), jnp.float32),
        "in_proj_b": 0.1 * jax.random.normal(k2, (3 * tsz,), jnp.float32),
        "out_proj_w": 0.1 * jax.random.normal(k3, (qsz, tsz), jnp.float32),
        "out_proj_b": 0.1 * jax.random.normal(k4, (qsz,), jnp.float32),
    }

    x = jax.random.normal(k5, (B, S, qsz), jnp.float32)
    # mask last two key positions of batch 1 (True = masked), plus causal mask
    key_padding_mask = jnp.zeros((B, S), jnp.bool_).at[1, 6:].set(True)

    ref_out, ref_ws = mha_reference(params, heads_n, x, x, x,
                                    key_padding_mask=key_padding_mask,
                                    is_causal=True)

    # 1) PyTorch-compatible path (returns attention weights), exact f32 math.
    out, attn_ws = mha_forward(params, heads_n, x, x, x,
                               key_padding_mask=key_padding_mask,
                               is_causal=True, need_weights=True)
    out = jax.block_until_ready(out)
    attn_ws = jax.block_until_ready(attn_ws)
    assert out.shape == (B, S, qsz)
    assert attn_ws.shape == (B, heads_n, S, S)
    assert jnp.allclose(out, ref_out, atol=1e-5, rtol=1e-5)
    assert jnp.allclose(attn_ws, ref_ws, atol=1e-5, rtol=1e-5)

    # 2) Flash path (no weight writeback), f32 compute, exact epilogue division.
    out_f, ws_f = mha_forward(params, heads_n, x, x, x,
                              key_padding_mask=key_padding_mask,
                              is_causal=True, need_weights=False)
    out_f = jax.block_until_ready(out_f)
    assert ws_f is None
    assert jnp.allclose(out_f, ref_out, atol=1e-4, rtol=1e-4)

    # 3) Flash path with bf16 MXU operands (softmax math stays f32).
    out_bf, _ = mha_forward(params, heads_n, x, x, x,
                            key_padding_mask=key_padding_mask,
                            is_causal=True, need_weights=False,
                            compute_dtype=jnp.bfloat16)
    out_bf = jax.block_until_ready(out_bf)
    assert jnp.allclose(out_bf, ref_out, atol=5e-2, rtol=5e-2)

    print("KERNEL_OK")
</pallas_src>

<mosaic_0001>
module attributes {stable_mosaic.version = 11 : i64} {
  func.func @_linear_kernel(%arg0: i32, %arg1: i32, %arg2: i32, %arg3: memref<16x32xf32, #tpu.memory_space<vmem>>, %arg4: memref<32x96xf32, #tpu.memory_space<vmem>>, %arg5: memref<1x96xf32, #tpu.memory_space<vmem>>, %arg6: memref<16x96xf32, #tpu.memory_space<vmem>>, %arg7: memref<16x96xf32, #tpu.memory_space<vmem>>) attributes {dimension_semantics = [#tpu.dimension_semantics<parallel>, #tpu.dimension_semantics<parallel>, #tpu.dimension_semantics<arbitrary>], iteration_bounds = array<i64: 1, 1, 1>, scalar_prefetch = 0 : i64, scratch_operands = 1 : i64, tpu.core_type = #tpu.core_type<tc>, window_params = [{transform_indices = @transform_0, window_bounds = array<i64: 16, 32>}, {transform_indices = @transform_1, window_bounds = array<i64: 32, 96>}, {transform_indices = @transform_2, window_bounds = array<i64: 1, 96>}, {transform_indices = @transform_3, window_bounds = array<i64: 16, 96>}]} {
    %c0_i32 = arith.constant 0 : i32
    %0 = arith.cmpi eq, %arg2, %c0_i32 : i32
    %1 = arith.extui %0 : i1 to i32
    %c0_i32_0 = arith.constant 0 : i32
    %2 = arith.cmpi ne, %1, %c0_i32_0 : i32
    scf.if %2 {
      %cst_10 = arith.constant 0.000000e+00 : f32
      %12 = vector.broadcast %cst_10 : f32 to vector<16x96xf32>
      %c0_11 = arith.constant 0 : index
      %c0_12 = arith.constant 0 : index
      %13 = vector.load %arg7[%c0_11, %c0_12] : memref<16x96xf32, #tpu.memory_space<vmem>>, vector<16x96xf32>
      tpu.vector_store %arg7[%c0_11, %c0_12], %12 {strides = array<i32>} : memref<16x96xf32, #tpu.memory_space<vmem>>, vector<16x96xf32>,
    } else {
    }
    %c0 = arith.constant 0 : index
    %c0_1 = arith.constant 0 : index
    %3 = vector.load %arg7[%c0, %c0_1] : memref<16x96xf32, #tpu.memory_space<vmem>>, vector<16x96xf32>
    %c0_2 = arith.constant 0 : index
    %c0_3 = arith.constant 0 : index
    %4 = vector.load %arg3[%c0_2, %c0_3] : memref<16x32xf32, #tpu.memory_space<vmem>>, vector<16x32xf32>
    %c0_4 = arith.constant 0 : index
    %c0_5 = arith.constant 0 : index
    %5 = vector.load %arg4[%c0_4, %c0_5] : memref<32x96xf32, #tpu.memory_space<vmem>>, vector<32x96xf32>
    %cst = arith.constant dense<0.000000e+00> : vector<16x96xf32>
    %6 = tpu.matmul %4, %5, %cst {dimension_numbers = #tpu.dot_dimension_numbers<[1], [0], [0], [1], [0, 0, 1, 1], [], []>} : vector<16x32xf32>, vector<32x96xf32>, vector<16x96xf32> -> vector<16x96xf32>
    %7 = arith.addf %3, %6 : vector<16x96xf32>
    %c0_6 = arith.constant 0 : index
    %c0_7 = arith.constant 0 : index
    %8 = vector.load %arg7[%c0_6, %c0_7] : memref<16x96xf32, #tpu.memory_space<vmem>>, vector<16x96xf32>
    tpu.vector_store %arg7[%c0_6, %c0_7], %7 {strides = array<i32>} : memref<16x96xf32, #tpu.memory_space<vmem>>, vector<16x96xf32>,
    %c0_i32_8 = arith.constant 0 : i32
    %9 = arith.cmpi eq, %arg2, %c0_i32_8 : i32
    %10 = arith.extui %9 : i1 to i32
    %c0_i32_9 = arith.constant 0 : i32
    %11 = arith.cmpi ne, %10, %c0_i32_9 : i32
    scf.if %11 {
      %c0_10 = arith.constant 0 : index
      %c0_11 = arith.constant 0 : index
      %12 = vector.load %arg7[%c0_10, %c0_11] : memref<16x96xf32, #tpu.memory_space<vmem>>, vector<16x96xf32>
      %c0_12 = arith.constant 0 : index
      %c0_13 = arith.constant 0 : index
      %13 = vector.load %arg5[%c0_12, %c0_13] : memref<1x96xf32, #tpu.memory_space<vmem>>, vector<1x96xf32>
      %14 = vector.broadcast %13 : vector<1x96xf32> to vector<16x96xf32>
      %15 = arith.addf %12, %14 : vector<16x96xf32>
      %c0_14 = arith.constant 0 : index
      %c0_15 = arith.constant 0 : index
      %16 = vector.load %arg6[%c0_14, %c0_15] : memref<16x96xf32, #tpu.memory_space<vmem>>, vector<16x96xf32>
      tpu.vector_store %arg6[%c0_14, %c0_15], %15 {strides = array<i32>} : memref<16x96xf32, #tpu.memory_space<vmem>>, vector<16x96xf32>,
    } else {
    }
    return
  }
  func.func @transform_0(%arg0: i32, %arg1: i32, %arg2: i32) -> (i32, i32) {
    %c0_i32 = arith.constant 0 : i32
    return %arg0, %arg2 : i32, i32
  }
  func.func @transform_1(%arg0: i32, %arg1: i32, %arg2: i32) -> (i32, i32) {
    %c0_i32 = arith.constant 0 : i32
    return %arg2, %arg1 : i32, i32
  }
  func.func @transform_2(%arg0: i32, %arg1: i32, %arg2: i32) -> (i32, i32) {
    %c0_i32 = arith.constant 0 : i32
    %c0_i32_0 = arith.constant 0 : i32
    return %c0_i32, %arg1 : i32, i32
  }
  func.func @transform_3(%arg0: i32, %arg1: i32, %arg2: i32) -> (i32, i32) {
    %c0_i32 = arith.constant 0 : i32
    return %arg0, %arg1 : i32, i32
  }
}

</mosaic_0001>

<bundles_post_ra>
// kernel: tpu_custom_call.1
= control target key start
LH: loop header
LB: loop body
LE: loop exit
PB: predicated region body
PF: predicated region fallthrough
CT: control target
= control target key end

     0   :  { %8 = vsyncpa [#allocation4], 0  ;;  %s365_s0 = inlined_call_operand.hbm [shape: f32[16,32], index: 0, kind: input, shape index: {}]   ;;  %s366_s1 = inlined_call_operand.hbm [shape: f32[32,96], index: 1, kind: input, shape index: {}]   ;;  %s367_s2 = inlined_call_operand.vmem [shape: f32[1,96], index: 2, kind: input, shape index: {}]   ;;  %s368_s3 = inlined_call_operand.hbm [shape: f32[16,96], index: 3, kind: output, shape index: {}]  }
   0x1   :  { %9 = vsyncpa [#allocation7], 0 }
   0x2   :  { %10 = vsyncpa [#allocation5], 0  ;;  %s285_s12 = smov [#allocation3]   ;;  %s213_s16 = scalar_lea.hbm %s365_s0, 256 }
   0x3   :  { %s16_s13 = sshll.u32 %s285_s12, 4  ;;  %p214_p0 = scmp.ne.s32.totalorder %s365_s0, %s213_s16  ;;  %s17_s13 = int_to_ptr.vmem [resolvable:$true] %s16_s13 }
   0x4   :  { %p217_p1 = scmp.lt.u32.totalorder %s213_s16, %s365_s0 }
   0x6   :  { %p219_p2 = pnand %p217_p1, %p214_p0 }
   0x8   :  { %222 = shalt.err (!%p219_p2)
}
   0x9   :  { %s223_s21 = scalar_lea.vmem %s17_s13, 256  ;;  %p228_p4 = scmp.lt.s32.totalorder %s17_s13, %s17_s13 }
   0xa   :  { %p224_p3 = scmp.ne.s32.totalorder %s17_s13, %s223_s21  ;;  %p229_p5 = scmp.lt.s32.totalorder %s223_s21, %s223_s21 }
   0xc   :  { %p230_p6 = por %p229_p5, %p228_p4 }
   0xe   :  { %p231_p7 = pnand %p230_p6, %p224_p3 }
  0x10   :  { %234 = shalt.err (!%p231_p7)
}
  0x11   :  { %s286_s22 = smov 128   ;;  %s287_s23 = smov 8  }
  0x12   :  { %22 = dma.hbm_to_vmem [thread:$0]  %s365_s0, 256, %s17_s13, [#allocation4], %s286_s22, %s286_s22, %s287_s23  }
  0x13   :  { %s288_s26 = smov [#allocation6]   ;;  %s235_s30 = scalar_lea.hbm %s366_s1, 512 }
  0x14   :  { %s28_s27 = sshll.u32 %s288_s26, 4  ;;  %p236_p8 = scmp.ne.s32.totalorder %s366_s1, %s235_s30  ;;  %s29_s27 = int_to_ptr.vmem [resolvable:$true] %s28_s27 }
  0x15   :  { %p239_p9 = scmp.lt.u32.totalorder %s235_s30, %s366_s1 }
  0x17   :  { %p241_p10 = pnand %p239_p9, %p236_p8 }
  0x19   :  { %244 = shalt.err (!%p241_p10)
}
  0x1a   :  { %s245_s8 = scalar_lea.vmem %s29_s27, 512  ;;  %p250_p12 = scmp.lt.s32.totalorder %s29_s27, %s29_s27 }
  0x1b   :  { %p246_p11 = scmp.ne.s32.totalorder %s29_s27, %s245_s8  ;;  %p251_p13 = scmp.lt.s32.totalorder %s245_s8, %s245_s8 }
  0x1d   :  { %p252_p0 = por %p251_p13, %p250_p12 }
  0x1f   :  { %p253_p1 = pnand %p252_p0, %p246_p11 }
  0x21   :  { %256 = shalt.err (!%p253_p1)
}
  0x22   :  { %34 = dma.hbm_to_vmem [thread:$0]  %s366_s1, 512, %s29_s27, [#allocation7], %s286_s22, %s286_s22, %s287_s23  }
  0x23   :  { %279 = dma.done.wait [#allocation4], 256  }
  0x24   :  { %280 = vsyncadd [#allocation4], 4294967040 }
  0x25   :  { %281 = dma.done.wait [#allocation7], 512  }
  0x26   :  { %282 = vsyncadd [#allocation7], 4294966784  ;;  %vm47_vm0 = vcmask 785408   ;;  %v289_v0 = vmov 0.0   ;;  %vm58_vm1 = vcmask 261120   ;;  %v54_v1 = vld [vmem:[#allocation6] sm:$0xff] }
  0x27   :  { %49 = vst.msk [vmem:[#allocation2 + $0x8] sm:$0xff] %vm47_vm0, %v289_v0  ;;  %48 = vst.msk [vmem:[#allocation2] sm:$0xff] %vm47_vm0, %v289_v0  ;;  %v55_v2 = vld [vmem:[#allocation6 + $0x8] sm:$0xff]  ;;  %v56_v3 = vld [vmem:[#allocation6 + $0x10] sm:$0xff]  ;;  %s290_s11 = smov [#allocation8]  }
  0x28   :  { %v199_v4 = vpack.c.bf16 %v55_v2, %v54_v1  ;;  %v57_v5 = vld [vmem:[#allocation6 + $0x18] sm:$0xff]  ;;  %v52_v6 = vld [vmem:[#allocation3] sm:$0xff]  ;;  %v181_v15 = vld [vmem:[%s367_s2] ss:$0 sm:$0xff]  ;;  %s166_s12 = sshll.u32 %s290_s11, 4  ;;  %s167_s12 = int_to_ptr.vmem [resolvable:$true] %s166_s12 }
  0x29   :  { %v203_v7 = vpack.c.bf16 %v57_v5, %v56_v3  ;;  %196 = vmatprep.mubr.msk.f32.mxu0 %vm58_vm1, %v52_v6  ;;  %v53_v8 = vld [vmem:[#allocation3 + $0x8] sm:$0xff]  ;;  %s257_s13 = scalar_lea.vmem %s167_s12, 256  ;;  %p262_p3 = scmp.lt.s32.totalorder %s167_s12, %s167_s12 }
  0x2a   :  { %200 = vmatprep.subr.bf16.mxu0 %v199_v4  ;;  %p258_p2 = scmp.ne.s32.totalorder %s167_s12, %s257_s13  ;;  %p263_p4 = scmp.lt.s32.totalorder %s257_s13, %s257_s13 }
  0x2b   :  { %202 = vmatpush3.bf16.msra.mxu0 %v199_v4 }
  0x2c   :  { %204 = vmatprep.subr.bf16.mxu0 %v203_v7  ;;  %p264_p5 = por %p263_p4, %p262_p3 }
  0x2e   :  { %v51_v9 = vld [vmem:[#allocation2 + $0x8] sm:$0xff]  ;;  %v50_v10 = vld [vmem:[#allocation2] sm:$0xff]  ;;  %p265_p6 = pnand %p264_p5, %p258_p2 }
  0x2f   :  { %206 = vmatpush3.bf16.msra.mxu0 %v203_v7 }
  0x32   :  { %197 = vmatmul.mubr.msk.f32.vlgmr.msra.gmra.mrb[0].mxu0 %vm58_vm1, %v53_v8 }
 0x105   :  { %v198_v11 = vpop.f32.mrb[0].mxu0 }
 0x106   :  { %v141_v12 = vadd.f32 %v198_v11, %v51_v9  ;;  %v131_v13 = vpop.f32.mrb[1].mxu0 }
 0x107   :  { %v140_v14 = vadd.f32 %v131_v13, %v50_v10 }
 0x108   :  { %144 = vst.msk [vmem:[#allocation2 + $0x8] sm:$0xff] %vm47_vm0, %v141_v12 }
 0x109   :  { %143 = vst.msk [vmem:[#allocation2] sm:$0xff] %vm47_vm0, %v140_v14 }
 0x10f   :  { %v149_v16 = vld [vmem:[#allocation2 + $0x8] sm:$0xff] }
 0x110   :  { %v148_v17 = vld [vmem:[#allocation2] sm:$0xff]  ;;  %v158_v18 = vadd.f32 %v181_v15, %v149_v16 }
 0x111   :  { %v157_v19 = vadd.f32 %v181_v15, %v148_v17 }
 0x112   :  { %160 = vst.msk [vmem:[#allocation8 + $0x8] sm:$0xff] %vm47_vm0, %v158_v18 }
 0x113   :  { %159 = vst.msk [vmem:[#allocation8] sm:$0xff] %vm47_vm0, %v157_v19 }
 0x114   :  { %268 = shalt.err (!%p265_p6)
}
 0x115   :  { %s269_s15 = scalar_lea.hbm %s368_s3, 256 }
 0x116   :  { %p270_p7 = scmp.ne.s32.totalorder %s368_s3, %s269_s15  ;;  %p273_p8 = scmp.lt.u32.totalorder %s269_s15, %s368_s3 }
 0x118   :  { %p275_p9 = pnand %p273_p8, %p270_p7 }
 0x11a   :  { %278 = shalt.err (!%p275_p9)
}
 0x11b   :  { %172 = dma.vmem_to_hbm [thread:$0]  %s167_s12, 256, %s368_s3, [#allocation5], %s286_s22, %s286_s22, %s287_s23  }
 0x11c   :  { %283 = dma.done.wait [#allocation5], 256  }
 0x11d   :  { %284 = vsyncadd [#allocation5], 4294967040 }
 0x11e   :  { %176 = vsyncpa [#allocation4], 1 }
 0x11f   :  { %177 = vsyncpa [#allocation7], 1 }
 0x120   :  { %178 = vsyncpa [#allocation5], 1 }

</bundles_post_ra>
